<compile_context>
chip_gen: v5e
topology: v5e:2x2
jax: 0.10.0
libtpu: 0.0.40
codegen_flags: <defaults>
</compile_context>

<pallas_src>
import jax
import jax.numpy as jnp
from jax import lax
from jax.experimental import pallas as pl
from jax.experimental.pallas import tpu as pltpu
import numpy as np


def _round_up(x, m):
    return ((x + m - 1) // m) * m


def cbow_kernel(idx_ref, emb_ref, wt_ref, b_ref, out_ref):
    """One batch tile of the CBOW forward.

    idx_ref: (TB, n_ctx) int32   context token ids (VMEM)
    emb_ref: (V, D)      bf16    embedding table (VMEM-resident across grid)
    wt_ref:  (D, V)      bf16    linear weight, pre-transposed (resident)
    b_ref:   (1, V)      f32     linear bias (resident)
    out_ref: (TB, V)     f32     log_softmax(logits)
    """
    TB, n_ctx = idx_ref.shape
    V = emb_ref.shape[0]

    # --- Embedding gather + mean as one MXU matmul --------------------------
    # counts[b, v] = (#context slots of example b with token id v) / n_ctx.
    # Out-of-range token ids never match and thus contribute zero (PyTorch's
    # nn.Embedding would raise instead).
    ids = idx_ref[...]                                            # (TB, n_ctx)
    vocab_ids = lax.broadcasted_iota(jnp.int32, (TB, V), 1)       # (TB, V)
    counts = jnp.zeros((TB, V), jnp.float32)
    for i in range(n_ctx):          # static unroll: short fixed trip count
        counts = counts + (vocab_ids == ids[:, i:i + 1]).astype(jnp.float32)
    counts = counts * (1.0 / n_ctx)         # fold the mean (f32, pre-cast)

    x = jnp.dot(counts.astype(jnp.bfloat16), emb_ref[...],
                preferred_element_type=jnp.float32)               # (TB, D) f32

    # --- Linear: x @ W^T + b  (W stored pre-transposed as (D, V)) -----------
    logits = jnp.dot(x.astype(jnp.bfloat16), wt_ref[...],
                     preferred_element_type=jnp.float32) + b_ref[...]  # (TB, V)

    # --- log-softmax over the vocab dim (all f32, lane-dense output) --------
    m = jnp.max(logits, axis=-1, keepdims=True)
    lse = m + jnp.log(jnp.sum(jnp.exp(logits - m), axis=-1, keepdims=True))
    out_ref[...] = logits - lse


def prepare_cbow_params(emb_table, linear_w, linear_b):
    """One-time (init-time) dtype/layout prep -- NOT per forward call."""
    V, D = emb_table.shape
    return {
        "emb_bf": jnp.asarray(emb_table, jnp.bfloat16),           # (V, D) bf16
        "wt_bf": jnp.asarray(linear_w, jnp.bfloat16).T,           # (D, V) bf16
        "b2": jnp.asarray(linear_b, jnp.float32).reshape(1, V),   # (1, V) f32
    }


def cbow_forward_batched(indices, params, *, batch_tile=128):
    """indices: (B, n_ctx) int -> (B, V) f32 log-probs."""
    B, n_ctx = indices.shape
    V, D = params["emb_bf"].shape

    tb = min(batch_tile, _round_up(B, 8))        # sublane-aligned batch tile
    Bp = _round_up(B, tb)
    idx = jnp.asarray(indices, jnp.int32)
    if Bp != B:
        idx = jnp.pad(idx, ((0, Bp - B), (0, 0)))    # pad rows use token id 0

    out = pl.pallas_call(
        cbow_kernel,
        out_shape=jax.ShapeDtypeStruct((Bp, V), jnp.float32),
        grid_spec=pltpu.PrefetchScalarGridSpec(
            num_scalar_prefetch=0,
            grid=(Bp // tb,),
            in_specs=[
                pl.BlockSpec((tb, n_ctx), lambda b: (b, 0)),   # index tile
                pl.BlockSpec((V, D), lambda b: (0, 0)),        # emb: resident
                pl.BlockSpec((D, V), lambda b: (0, 0)),        # W^T: resident
                pl.BlockSpec((1, V), lambda b: (0, 0)),        # bias: resident
            ],
            out_specs=pl.BlockSpec((tb, V), lambda b: (b, 0)),
        ),
        compiler_params=pltpu.CompilerParams(
            dimension_semantics=("parallel",)),
    )(idx, params["emb_bf"], params["wt_bf"], params["b2"])
    return out[:B]


def cbow_forward(indices, params):
    """Single-context forward matching the PyTorch module: (n_ctx,) -> (1, V)."""
    return cbow_forward_batched(jnp.asarray(indices).reshape(1, -1),
                                params, batch_tile=8)[:1]


if __name__ == "__main__":
    VOCAB_SIZE = 256
    EMBEDDING_DIM = 128
    CONTEXT_SIZE = 8
    BATCH = 32

    key = jax.random.PRNGKey(0)
    k_emb, k_w, k_b, k_idx = jax.random.split(key, 4)

    # Deterministic synthetic parameters (shapes of nn.Embedding / nn.Linear).
    emb_table = jax.random.normal(k_emb, (VOCAB_SIZE, EMBEDDING_DIM), jnp.float32) * 0.1
    linear_w = jax.random.normal(k_w, (VOCAB_SIZE, EMBEDDING_DIM), jnp.float32) * 0.1
    linear_b = jax.random.normal(k_b, (VOCAB_SIZE,), jnp.float32) * 0.1

    params = prepare_cbow_params(emb_table, linear_w, linear_b)   # once, at init

    # Batched contexts (perf-relevant path) + the module-exact single example.
    idx_batch = jax.random.randint(k_idx, (BATCH, CONTEXT_SIZE), 0, VOCAB_SIZE, jnp.int32)

    out_batch = jax.block_until_ready(cbow_forward_batched(idx_batch, params))
    out_single = jax.block_until_ready(cbow_forward(idx_batch[0], params))

    # Reference (mirrors the PyTorch forward) in plain f32 JAX.
    def ref_forward(idx_row):
        x = jnp.mean(emb_table[idx_row], axis=0).reshape(1, -1)
        return jax.nn.log_softmax(x @ linear_w.T + linear_b, axis=-1)

    ref_batch = jnp.concatenate([ref_forward(idx_batch[i]) for i in range(BATCH)], axis=0)

    assert out_batch.shape == (BATCH, VOCAB_SIZE)
    assert out_single.shape == (1, VOCAB_SIZE)
    # Tolerance loosened because the MXU matmuls use bf16 operands (f32 acc).
    np.testing.assert_allclose(np.asarray(out_batch), np.asarray(ref_batch),
                               rtol=2e-2, atol=2e-2)
    np.testing.assert_allclose(np.asarray(out_single), np.asarray(ref_batch[:1]),
                               rtol=2e-2, atol=2e-2)

    print("KERNEL_OK")
</pallas_src>

<mosaic_0001>
module attributes {stable_mosaic.version = 11 : i64} {
  func.func @cbow_kernel(%arg0: i32, %arg1: memref<32x8xi32, #tpu.memory_space<vmem>>, %arg2: memref<256x128xbf16, #tpu.memory_space<vmem>>, %arg3: memref<128x256xbf16, #tpu.memory_space<vmem>>, %arg4: memref<1x256xf32, #tpu.memory_space<vmem>>, %arg5: memref<32x256xf32, #tpu.memory_space<vmem>>) attributes {dimension_semantics = [#tpu.dimension_semantics<parallel>], iteration_bounds = array<i64: 1>, scalar_prefetch = 0 : i64, scratch_operands = 0 : i64, tpu.core_type = #tpu.core_type<tc>, window_params = [{transform_indices = @transform_0, window_bounds = array<i64: 32, 8>}, {pipeline_mode = #tpu.pipeline_mode<synchronous>, transform_indices = @transform_1, window_bounds = array<i64: 256, 128>}, {pipeline_mode = #tpu.pipeline_mode<synchronous>, transform_indices = @transform_2, window_bounds = array<i64: 128, 256>}, {pipeline_mode = #tpu.pipeline_mode<synchronous>, transform_indices = @transform_3, window_bounds = array<i64: 1, 256>}, {transform_indices = @transform_4, window_bounds = array<i64: 32, 256>}]} {
    %c0 = arith.constant 0 : index
    %c0_0 = arith.constant 0 : index
    %0 = vector.load %arg1[%c0, %c0_0] : memref<32x8xi32, #tpu.memory_space<vmem>>, vector<32x8xi32>
    %1 = tpu.iota {dimensions = array<i32: 1>} : vector<32x256xi32>
    %cst = arith.constant 0.000000e+00 : f32
    %2 = vector.broadcast %cst : f32 to vector<32x256xf32>
    %3 = vector.extract_strided_slice %0 {offsets = [0, 0], sizes = [32, 1], strides = [1, 1]} : vector<32x8xi32> to vector<32x1xi32>
    %4 = vector.broadcast %3 : vector<32x1xi32> to vector<32x256xi32>
    %5 = arith.cmpi eq, %1, %4 : vector<32x256xi32>
    %6 = arith.extui %5 : vector<32x256xi1> to vector<32x256xi32>
    %7 = arith.sitofp %6 : vector<32x256xi32> to vector<32x256xf32>
    %8 = arith.addf %2, %7 : vector<32x256xf32>
    %9 = vector.extract_strided_slice %0 {offsets = [0, 1], sizes = [32, 1], strides = [1, 1]} : vector<32x8xi32> to vector<32x1xi32>
    %10 = vector.broadcast %9 : vector<32x1xi32> to vector<32x256xi32>
    %11 = arith.cmpi eq, %1, %10 : vector<32x256xi32>
    %12 = arith.extui %11 : vector<32x256xi1> to vector<32x256xi32>
    %13 = arith.sitofp %12 : vector<32x256xi32> to vector<32x256xf32>
    %14 = arith.addf %8, %13 : vector<32x256xf32>
    %15 = vector.extract_strided_slice %0 {offsets = [0, 2], sizes = [32, 1], strides = [1, 1]} : vector<32x8xi32> to vector<32x1xi32>
    %16 = vector.broadcast %15 : vector<32x1xi32> to vector<32x256xi32>
    %17 = arith.cmpi eq, %1, %16 : vector<32x256xi32>
    %18 = arith.extui %17 : vector<32x256xi1> to vector<32x256xi32>
    %19 = arith.sitofp %18 : vector<32x256xi32> to vector<32x256xf32>
    %20 = arith.addf %14, %19 : vector<32x256xf32>
    %21 = vector.extract_strided_slice %0 {offsets = [0, 3], sizes = [32, 1], strides = [1, 1]} : vector<32x8xi32> to vector<32x1xi32>
    %22 = vector.broadcast %21 : vector<32x1xi32> to vector<32x256xi32>
    %23 = arith.cmpi eq, %1, %22 : vector<32x256xi32>
    %24 = arith.extui %23 : vector<32x256xi1> to vector<32x256xi32>
    %25 = arith.sitofp %24 : vector<32x256xi32> to vector<32x256xf32>
    %26 = arith.addf %20, %25 : vector<32x256xf32>
    %27 = vector.extract_strided_slice %0 {offsets = [0, 4], sizes = [32, 1], strides = [1, 1]} : vector<32x8xi32> to vector<32x1xi32>
    %28 = vector.broadcast %27 : vector<32x1xi32> to vector<32x256xi32>
    %29 = arith.cmpi eq, %1, %28 : vector<32x256xi32>
    %30 = arith.extui %29 : vector<32x256xi1> to vector<32x256xi32>
    %31 = arith.sitofp %30 : vector<32x256xi32> to vector<32x256xf32>
    %32 = arith.addf %26, %31 : vector<32x256xf32>
    %33 = vector.extract_strided_slice %0 {offsets = [0, 5], sizes = [32, 1], strides = [1, 1]} : vector<32x8xi32> to vector<32x1xi32>
    %34 = vector.broadcast %33 : vector<32x1xi32> to vector<32x256xi32>
    %35 = arith.cmpi eq, %1, %34 : vector<32x256xi32>
    %36 = arith.extui %35 : vector<32x256xi1> to vector<32x256xi32>
    %37 = arith.sitofp %36 : vector<32x256xi32> to vector<32x256xf32>
    %38 = arith.addf %32, %37 : vector<32x256xf32>
    %39 = vector.extract_strided_slice %0 {offsets = [0, 6], sizes = [32, 1], strides = [1, 1]} : vector<32x8xi32> to vector<32x1xi32>
    %40 = vector.broadcast %39 : vector<32x1xi32> to vector<32x256xi32>
    %41 = arith.cmpi eq, %1, %40 : vector<32x256xi32>
    %42 = arith.extui %41 : vector<32x256xi1> to vector<32x256xi32>
    %43 = arith.sitofp %42 : vector<32x256xi32> to vector<32x256xf32>
    %44 = arith.addf %38, %43 : vector<32x256xf32>
    %45 = vector.extract_strided_slice %0 {offsets = [0, 7], sizes = [32, 1], strides = [1, 1]} : vector<32x8xi32> to vector<32x1xi32>
    %46 = vector.broadcast %45 : vector<32x1xi32> to vector<32x256xi32>
    %47 = arith.cmpi eq, %1, %46 : vector<32x256xi32>
    %48 = arith.extui %47 : vector<32x256xi1> to vector<32x256xi32>
    %49 = arith.sitofp %48 : vector<32x256xi32> to vector<32x256xf32>
    %50 = arith.addf %44, %49 : vector<32x256xf32>
    %cst_1 = arith.constant 1.250000e-01 : f32
    %51 = vector.broadcast %cst_1 : f32 to vector<32x256xf32>
    %52 = arith.mulf %50, %51 : vector<32x256xf32>
    %53 = arith.truncf %52 : vector<32x256xf32> to vector<32x256xbf16>
    %c0_2 = arith.constant 0 : index
    %c0_3 = arith.constant 0 : index
    %54 = vector.load %arg2[%c0_2, %c0_3] : memref<256x128xbf16, #tpu.memory_space<vmem>>, vector<256x128xbf16>
    %cst_4 = arith.constant dense<0.000000e+00> : vector<32x128xf32>
    %55 = tpu.matmul %53, %54, %cst_4 {dimension_numbers = #tpu.dot_dimension_numbers<[1], [0], [0], [1], [0, 0, 1, 1], [], []>} : vector<32x256xbf16>, vector<256x128xbf16>, vector<32x128xf32> -> vector<32x128xf32>
    %56 = arith.truncf %55 : vector<32x128xf32> to vector<32x128xbf16>
    %c0_5 = arith.constant 0 : index
    %c0_6 = arith.constant 0 : index
    %57 = vector.load %arg3[%c0_5, %c0_6] : memref<128x256xbf16, #tpu.memory_space<vmem>>, vector<128x256xbf16>
    %cst_7 = arith.constant dense<0.000000e+00> : vector<32x256xf32>
    %58 = tpu.matmul %56, %57, %cst_7 {dimension_numbers = #tpu.dot_dimension_numbers<[1], [0], [0], [1], [0, 0, 1, 1], [], []>} : vector<32x128xbf16>, vector<128x256xbf16>, vector<32x256xf32> -> vector<32x256xf32>
    %c0_8 = arith.constant 0 : index
    %c0_9 = arith.constant 0 : index
    %59 = vector.load %arg4[%c0_8, %c0_9] : memref<1x256xf32, #tpu.memory_space<vmem>>, vector<1x256xf32>
    %60 = vector.broadcast %59 : vector<1x256xf32> to vector<32x256xf32>
    %61 = arith.addf %58, %60 : vector<32x256xf32>
    %cst_10 = arith.constant dense<0xFF800000> : vector<32xf32>
    %62 = vector.multi_reduction <maximumf>, %61, %cst_10 [1] : vector<32x256xf32> to vector<32xf32>
    %63 = vector.shape_cast %62 : vector<32xf32> to vector<32x1xf32>
    %64 = vector.broadcast %63 : vector<32x1xf32> to vector<32x256xf32>
    %65 = arith.subf %61, %64 : vector<32x256xf32>
    %66 = math.exp %65 : vector<32x256xf32>
    %cst_11 = arith.constant dense<0.000000e+00> : vector<32xf32>
    %67 = vector.multi_reduction <add>, %66, %cst_11 [1] : vector<32x256xf32> to vector<32xf32>
    %68 = vector.shape_cast %67 : vector<32xf32> to vector<32x1xf32>
    %69 = math.log %68 : vector<32x1xf32>
    %70 = arith.addf %63, %69 : vector<32x1xf32>
    %71 = vector.broadcast %70 : vector<32x1xf32> to vector<32x256xf32>
    %72 = arith.subf %61, %71 : vector<32x256xf32>
    %c0_12 = arith.constant 0 : index
    %c0_13 = arith.constant 0 : index
    %73 = vector.load %arg5[%c0_12, %c0_13] : memref<32x256xf32, #tpu.memory_space<vmem>>, vector<32x256xf32>
    tpu.vector_store %arg5[%c0_12, %c0_13], %72 {strides = array<i32>} : memref<32x256xf32, #tpu.memory_space<vmem>>, vector<32x256xf32>,
    return
  }
  func.func @transform_0(%arg0: i32) -> (i32, i32) {
    %c0_i32 = arith.constant 0 : i32
    %c0_i32_0 = arith.constant 0 : i32
    return %arg0, %c0_i32 : i32, i32
  }
  func.func @transform_1(%arg0: i32) -> (i32, i32) {
    %c0_i32 = arith.constant 0 : i32
    %c0_i32_0 = arith.constant 0 : i32
    %c0_i32_1 = arith.constant 0 : i32
    return %c0_i32, %c0_i32_0 : i32, i32
  }
  func.func @transform_2(%arg0: i32) -> (i32, i32) {
    %c0_i32 = arith.constant 0 : i32
    %c0_i32_0 = arith.constant 0 : i32
    %c0_i32_1 = arith.constant 0 : i32
    return %c0_i32, %c0_i32_0 : i32, i32
  }
  func.func @transform_3(%arg0: i32) -> (i32, i32) {
    %c0_i32 = arith.constant 0 : i32
    %c0_i32_0 = arith.constant 0 : i32
    %c0_i32_1 = arith.constant 0 : i32
    return %c0_i32, %c0_i32_0 : i32, i32
  }
  func.func @transform_4(%arg0: i32) -> (i32, i32) {
    %c0_i32 = arith.constant 0 : i32
    %c0_i32_0 = arith.constant 0 : i32
    return %arg0, %c0_i32 : i32, i32
  }
}

</mosaic_0001>

<bundles_post_ra>
// kernel: tpu_custom_call.1
= control target key start
LH: loop header
LB: loop body
LE: loop exit
PB: predicated region body
PF: predicated region fallthrough
CT: control target
= control target key end

     0   :  { %9 = vsyncpa [#allocation3], 0  ;;  %s1532_s0 = inlined_call_operand.vmem [shape: s32[32,8], index: 0, kind: input, shape index: {}]   ;;  %s1533_s1 = inlined_call_operand.hbm [shape: bf16[256,128], index: 1, kind: input, shape index: {}]   ;;  %s1534_s2 = inlined_call_operand.hbm [shape: bf16[128,256], index: 2, kind: input, shape index: {}]   ;;  %s1535_s3 = inlined_call_operand.vmem [shape: f32[1,256], index: 3, kind: input, shape index: {}]   ;;  %s1536_s4 = inlined_call_operand.hbm [shape: f32[32,256], index: 4, kind: output, shape index: {}]  }
   0x1   :  { %10 = vsyncpa [#allocation6], 0 }
   0x2   :  { %11 = vsyncpa [#allocation4], 0  ;;  %s18_s17 = sshll.u32 %s1533_s1, 4  ;;  %s1196_s18 = smov [#allocation2]   ;;  %s19_s17 = int_to_ptr.hbm [resolvable:$true] %s18_s17 }
   0x3   :  { %s20_s19 = sshll.u32 %s1196_s18, 4  ;;  %s31_s22 = sshll.u32 %s1534_s2, 4  ;;  %s21_s19 = int_to_ptr.vmem [resolvable:$true] %s20_s19  ;;  %s32_s22 = int_to_ptr.hbm [resolvable:$true] %s31_s22 }
   0x4   :  { %s1197_s23 = smov 64   ;;  %s1198_s24 = smov 4  }
   0x5   :  { %26 = dma.hbm_to_vmem [thread:$0]  %s19_s17, 2048, %s21_s19, [#allocation3], %s1197_s23, %s1197_s23, %s1198_s24  }
   0x6   :  { %s1199_s25 = smov [#allocation5]   ;;  %s1200_s27 = smov 128  }
   0x7   :  { %s33_s26 = sshll.u32 %s1199_s25, 4  ;;  %s1201_s28 = smov 8   ;;  %s34_s26 = int_to_ptr.vmem [resolvable:$true] %s33_s26 }
   0x8   :  { %39 = dma.hbm_to_vmem [thread:$0]  %s32_s22, 2048, %s34_s26, [#allocation6], %s1200_s27, %s1200_s27, %s1201_s28  }
   0x9   :  { %1190 = dma.done.wait [#allocation3], 2048  }
   0xa   :  { %1191 = vsyncadd [#allocation3], 4294965248 }
   0xb   :  { %1192 = dma.done.wait [#allocation6], 2048  }
   0xc   :  { %1193 = vsyncadd [#allocation6], 4294965248  ;;  %v1202_v0 = vmov 3   ;;  %v1203_v1 = vmov 1   ;;  %v1204_v2 = vmov 2   ;;  %v50_v3 = vld [vmem:[%s1532_s0] sm:$0xff]  ;;  %v54_v29 = vlaneseq }
   0xd   :  { %1069 = vset.pattern.permute.xlu0 %v1202_v0  ;;  %1067 = vset.pattern.permute.xlu1 %v1203_v1  ;;  %v51_v4 = vld [vmem:[%s1532_s0 + $0x8] sm:$0xff]  ;;  %v1205_v5 = vmov 0   ;;  %v1206_v6 = vmov 4   ;;  %v52_v7 = vld [vmem:[%s1532_s0 + $0x10] sm:$0xff]  ;;  %v1207_v8 = vmov 5   ;;  %v53_v9 = vld [vmem:[%s1532_s0 + $0x18] sm:$0xff] }
   0xe   :  { %1068 = vset.pattern.permute.xlu2 %v1204_v2  ;;  %190 = vperm.xlu0 %1069, %v50_v3   ;;  %v1208_v10 = vmov 6   ;;  %v1209_v11 = vmov 7   ;;  %v1024_v13 = vld [vmem:[#allocation2 + $0x38] sm:$0xff]  ;;  %v1023_v16 = vld [vmem:[#allocation2 + $0x30] sm:$0xff]  ;;  %v1022_v18 = vld [vmem:[#allocation2 + $0x28] sm:$0xff]  ;;  %v1265_v32 = vand.u32 127, %v54_v29 }
   0xf   :  { %102 = vperm.xlu1 %1067, %v50_v3   ;;  %146 = vperm.xlu2 %1068, %v50_v3   ;;  %v1032_v14 = vld [vmem:[#allocation2 + $0x78] sm:$0xff]  ;;  %v1031_v17 = vld [vmem:[#allocation2 + $0x70] sm:$0xff]  ;;  %v1030_v19 = vld [vmem:[#allocation2 + $0x68] sm:$0xff]  ;;  %v1210_v41 = vmov 0.0   ;;  %s811_s13 = sshll.u32 %s1536_s4, 4  ;;  %s1212_s14 = smov 256   ;;  %s812_s13 = int_to_ptr.hbm [resolvable:$true] %s811_s13 }
  0x10   :  { %549 = vmatpush.bf16.msra.mxu0 %v1024_v13  ;;  %568 = vmatpush.bf16.msra.mxu1 %v1032_v14  ;;  %v1021_v22 = vld [vmem:[#allocation2 + $0x20] sm:$0xff]  ;;  %v1020_v25 = vld [vmem:[#allocation2 + $0x18] sm:$0xff]  ;;  %v1019_v30 = vld [vmem:[#allocation2 + $0x10] sm:$0xff]  ;;  %v1272_v38 = vadd.s32 128, %v1265_v32  ;;  %s1213_s15 = smov 16  }
  0x11   :  { %v1029_v23 = vld [vmem:[#allocation2 + $0x60] sm:$0xff]  ;;  %v1028_v26 = vld [vmem:[#allocation2 + $0x58] sm:$0xff]  ;;  %v1027_v31 = vld [vmem:[#allocation2 + $0x50] sm:$0xff] }
  0x12   :  { %v1018_v34 = vld [vmem:[#allocation2 + $0x8] sm:$0xff]  ;;  %v1017_v39 = vld [vmem:[#allocation2] sm:$0xff] }
  0x13   :  { %v1026_v35 = vld [vmem:[#allocation2 + $0x48] sm:$0xff]  ;;  %v1025_v40 = vld [vmem:[#allocation2 + $0x40] sm:$0xff] }
  0x14   :  { %550 = vmatpush.bf16.msra.mxu0 %v1023_v16  ;;  %569 = vmatpush.bf16.msra.mxu1 %v1031_v17 }
  0x16   :  { %1070 = vset.pattern.permute.xlu0 %v1205_v5 }
  0x17   :  { %105 = vperm.xlu1 %1067, %v51_v4   ;;  %58 = vperm.xlu0 %1070, %v50_v3  }
  0x18   :  { %149 = vperm.xlu2 %1068, %v51_v4   ;;  %551 = vmatpush.bf16.msra.mxu0 %v1022_v18 }
  0x19   :  { %570 = vmatpush.bf16.msra.mxu1 %v1030_v19 }
  0x1c   :  { %552 = vmatpush.bf16.msra.mxu0 %v1021_v22 }
  0x1d   :  { %571 = vmatpush.bf16.msra.mxu1 %v1029_v23 }
  0x1f   :  { %1071 = vset.pattern.permute.xlu1 %v1202_v0  ;;  %61 = vperm.xlu0 %1070, %v51_v4  }
  0x20   :  { %193 = vperm.xlu1 %1071, %v51_v4   ;;  %1072 = vset.pattern.permute.xlu2 %v1206_v6 }
  0x21   :  { %234 = vperm.xlu2 %1072, %v50_v3   ;;  %553 = vmatpush.bf16.msra.mxu0 %v1020_v25 }
  0x22   :  { %572 = vmatpush.bf16.msra.mxu1 %v1028_v26 }
  0x25   :  { %554 = vmatpush.bf16.msra.mxu0 %v1019_v30 }
  0x26   :  { %573 = vmatpush.bf16.msra.mxu1 %v1027_v31 }
  0x27   :  { %64 = vperm.xlu0 %1070, %v52_v7  }
  0x28   :  { %1073 = vset.pattern.permute.xlu1 %v1206_v6 }
  0x29   :  { %237 = vperm.xlu1 %1073, %v51_v4   ;;  %1074 = vset.pattern.permute.xlu2 %v1207_v8 }
  0x2a   :  { %278 = vperm.xlu2 %1074, %v50_v3   ;;  %555 = vmatpush.bf16.msra.mxu0 %v1018_v34 }
  0x2b   :  { %574 = vmatpush.bf16.msra.mxu1 %v1026_v35 }
  0x2e   :  { %556 = vmatpush.bf16.msra.mxu0 %v1017_v39 }
  0x2f   :  { %1083 = vset.pattern.permute.xlu0 %v1204_v2  ;;  %575 = vmatpush.bf16.msra.mxu1 %v1025_v40 }
  0x30   :  { %155 = vperm.xlu0 %1083, %v53_v9  }
  0x31   :  { %1075 = vset.pattern.permute.xlu1 %v1208_v10 }
  0x32   :  { %322 = vperm.xlu1 %1075, %v50_v3   ;;  %1076 = vset.pattern.permute.xlu2 %v1208_v10 }
  0x33   :  { %325 = vperm.xlu2 %1076, %v51_v4  }
  0x38   :  { %1084 = vset.pattern.permute.xlu0 %v1207_v8 }
  0x39   :  { %281 = vperm.xlu0 %1084, %v51_v4  }
  0x3a   :  { %1077 = vset.pattern.permute.xlu1 %v1209_v11 }
  0x3b   :  { %366 = vperm.xlu1 %1077, %v50_v3   ;;  %1078 = vset.pattern.permute.xlu2 %v1209_v11 }
  0x3c   :  { %369 = vperm.xlu2 %1078, %v51_v4  }
  0x41   :  { %284 = vperm.xlu0 %1084, %v52_v7  }
  0x43   :  { %1079 = vset.pattern.permute.xlu1 %v1205_v5 }
  0x44   :  { %67 = vperm.xlu1 %1079, %v53_v9   ;;  %1080 = vset.pattern.permute.xlu2 %v1203_v1 }
  0x45   :  { %108 = vperm.xlu2 %1080, %v52_v7  }
  0x49   :  { %1093 = vset.pattern.permute.xlu0 %v1209_v11 }
  0x4a   :  { %375 = vperm.xlu0 %1093, %v53_v9  }
  0x4c   :  { %1081 = vset.pattern.permute.xlu1 %v1203_v1 }
  0x4d   :  { %111 = vperm.xlu1 %1081, %v53_v9   ;;  %1082 = vset.pattern.permute.xlu2 %v1204_v2 }
  0x4e   :  { %152 = vperm.xlu2 %1082, %v52_v7  }
  0x55   :  { %1085 = vset.pattern.permute.xlu1 %v1202_v0 }
  0x56   :  { %196 = vperm.xlu1 %1085, %v52_v7   ;;  %1086 = vset.pattern.permute.xlu2 %v1202_v0 }
  0x57   :  { %199 = vperm.xlu2 %1086, %v53_v9  }
  0x5e   :  { %1087 = vset.pattern.permute.xlu1 %v1206_v6 }
  0x5f   :  { %240 = vperm.xlu1 %1087, %v52_v7   ;;  %1088 = vset.pattern.permute.xlu2 %v1206_v6 }
  0x60   :  { %243 = vperm.xlu2 %1088, %v53_v9  }
  0x67   :  { %1089 = vset.pattern.permute.xlu1 %v1207_v8 }
  0x68   :  { %287 = vperm.xlu1 %1089, %v53_v9   ;;  %1090 = vset.pattern.permute.xlu2 %v1208_v10 }
  0x69   :  { %328 = vperm.xlu2 %1090, %v52_v7   ;;  %v1257_v12 = vpop.permute.xlu2 %146 }
  0x6a   :  { %vm157_vm4 = vcmp.eq.s32.totalorder %v1265_v32, %v1257_v12  ;;  %vm158_vm5 = vcmp.eq.s32.totalorder %v1272_v38, %v1257_v12 }
  0x6b   :  { %v841_v51 = vsel %vm157_vm4, 1.0, %v1210_v41  ;;  %v842_v52 = vsel %vm158_vm5, 1.0, %v1210_v41 }
  0x70   :  { %1091 = vset.pattern.permute.xlu1 %v1208_v10 }
  0x71   :  { %331 = vperm.xlu1 %1091, %v53_v9   ;;  %1092 = vset.pattern.permute.xlu2 %v1209_v11 }
  0x72   :  { %372 = vperm.xlu2 %1092, %v52_v7   ;;  %v1259_v15 = vpop.permute.xlu2 %149 }
  0x73   :  { %vm159_vm12 = vcmp.eq.s32.totalorder %v1265_v32, %v1259_v15  ;;  %vm160_vm13 = vcmp.eq.s32.totalorder %v1272_v38, %v1259_v15 }
  0x74   :  { %v843_v2 = vsel %vm159_vm12, 1.0, %v1210_v41  ;;  %v844_v3 = vsel %vm160_vm13, 1.0, %v1210_v41 }
  0x7b   :  { %v1263_v24 = vpop.permute.xlu2 %234 }
  0x7c   :  { %vm245_vm14 = vcmp.eq.s32.totalorder %v1265_v32, %v1263_v24  ;;  %vm246_vm15 = vcmp.eq.s32.totalorder %v1272_v38, %v1263_v24 }
  0x7d   :  { %v857_v4 = vsel %vm245_vm14, 1.0, %v1210_v41  ;;  %v858_v5 = vsel %vm246_vm15, 1.0, %v1210_v41 }
  0x80   :  { %v1261_v21 = vpop.permute.xlu0 %190 }
  0x81   :  { %v103_v20 = vpop.permute.xlu1 %102  ;;  %vm201_vm8 = vcmp.eq.s32.totalorder %v1265_v32, %v1261_v21  ;;  %vm202_vm9 = vcmp.eq.s32.totalorder %v1272_v38, %v1261_v21 }
  0x82   :  { %vm113_vm2 = vcmp.eq.s32.totalorder %v1265_v32, %v103_v20  ;;  %vm114_vm3 = vcmp.eq.s32.totalorder %v1272_v38, %v103_v20  ;;  %v849_v57 = vsel %vm201_vm8, 1.0, %v1210_v41  ;;  %v850_v58 = vsel %vm202_vm9, 1.0, %v1210_v41 }
  0x83   :  { %v833_v44 = vsel %vm113_vm2, 1.0, %v1210_v41  ;;  %v834_v45 = vsel %vm114_vm3, 1.0, %v1210_v41 }
  0x84   :  { %v1267_v33 = vpop.permute.xlu2 %278 }
  0x89   :  { %v106_v27 = vpop.permute.xlu1 %105  ;;  %v59_v28 = vpop.permute.xlu0 %58 }
  0x8a   :  { %vm69_vm0 = vcmp.eq.s32.totalorder %v1265_v32, %v59_v28  ;;  %vm70_vm1 = vcmp.eq.s32.totalorder %v1272_v38, %v59_v28  ;;  %vm115_vm10 = vcmp.eq.s32.totalorder %v1265_v32, %v106_v27  ;;  %vm116_vm11 = vcmp.eq.s32.totalorder %v1272_v38, %v106_v27 }
  0x8b   :  { %v825_v42 = vsel %vm69_vm0, 1.0, %v1210_v41  ;;  %v826_v43 = vsel %vm70_vm1, 1.0, %v1210_v41  ;;  %v835_v59 = vsel %vm115_vm10, 1.0, %v1210_v41  ;;  %v836_v60 = vsel %vm116_vm11, 1.0, %v1210_v41 }
  0x8c   :  { %v137_v47 = vadd.f32 %v833_v44, %v825_v42  ;;  %v138_v48 = vadd.f32 %v834_v45, %v826_v43  ;;  %vm289_vm0 = vcmp.eq.s32.totalorder %v1265_v32, %v1267_v33  ;;  %vm290_vm1 = vcmp.eq.s32.totalorder %v1272_v38, %v1267_v33 }
  0x8d   :  { %v1288_v49 = vpop.permute.xlu2 %325  ;;  %v865_v12 = vsel %vm289_vm0, 1.0, %v1210_v41  ;;  %v866_v13 = vsel %vm290_vm1, 1.0, %v1210_v41 }
  0x8e   :  { %v181_v53 = vadd.f32 %v841_v51, %v137_v47  ;;  %v182_v54 = vadd.f32 %v842_v52, %v138_v48  ;;  %vm335_vm8 = vcmp.eq.s32.totalorder %v1265_v32, %v1288_v49  ;;  %vm336_vm9 = vcmp.eq.s32.totalorder %v1272_v38, %v1288_v49 }
  0x8f   :  { %v875_v39 = vsel %vm335_vm8, 1.0, %v1210_v41  ;;  %v876_v40 = vsel %vm336_vm9, 1.0, %v1210_v41 }
  0x90   :  { %v225_v63 = vadd.f32 %v849_v57, %v181_v53  ;;  %v226_v0 = vadd.f32 %v850_v58, %v182_v54 }
  0x91   :  { %v62_v36 = vpop.permute.xlu0 %61 }
  0x92   :  { %v1269_v37 = vpop.permute.xlu1 %193  ;;  %vm71_vm6 = vcmp.eq.s32.totalorder %v1265_v32, %v62_v36  ;;  %vm72_vm7 = vcmp.eq.s32.totalorder %v1272_v38, %v62_v36  ;;  %v269_v10 = vadd.f32 %v857_v4, %v225_v63  ;;  %v270_v11 = vadd.f32 %v858_v5, %v226_v0 }
  0x93   :  { %v827_v55 = vsel %vm71_vm6, 1.0, %v1210_v41  ;;  %v828_v56 = vsel %vm72_vm7, 1.0, %v1210_v41  ;;  %vm203_vm2 = vcmp.eq.s32.totalorder %v1265_v32, %v1269_v37  ;;  %vm204_vm3 = vcmp.eq.s32.totalorder %v1272_v38, %v1269_v37 }
  0x94   :  { %v139_v61 = vadd.f32 %v835_v59, %v827_v55  ;;  %v140_v62 = vadd.f32 %v836_v60, %v828_v56  ;;  %v851_v14 = vsel %vm203_vm2, 1.0, %v1210_v41  ;;  %v852_v15 = vsel %vm204_vm3, 1.0, %v1210_v41 }
  0x95   :  { %v313_v22 = vadd.f32 %v865_v12, %v269_v10  ;;  %v314_v23 = vadd.f32 %v866_v13, %v270_v11  ;;  %v1013_v10 = vld [vmem:[#allocation5 + $0x78] sm:$0xf0]  ;;  %v1003_v11 = vld [vmem:[#allocation5 + $0x60] sm:$0xf]  ;;  %v1046_v13 = vld [vmem:[#allocation5 + $0x64] sm:$0xf0] }
  0x96   :  { %v370_v7 = vpop.permute.xlu2 %369  ;;  %v183_v8 = vadd.f32 %v843_v2, %v139_v61  ;;  %v184_v9 = vadd.f32 %v844_v3, %v140_v62 }
  0x97   :  { %vm379_vm10 = vcmp.eq.s32.totalorder %v1265_v32, %v370_v7  ;;  %vm380_vm11 = vcmp.eq.s32.totalorder %v1272_v38, %v370_v7  ;;  %v1047_v7 = vld [vmem:[#allocation5 + $0x74] sm:$0xf] }
  0x98   :  { %v227_v18 = vadd.f32 %v851_v14, %v183_v8  ;;  %v228_v19 = vadd.f32 %v852_v15, %v184_v9  ;;  %v883_v42 = vsel %vm379_vm10, 1.0, %v1210_v41  ;;  %v884_v43 = vsel %vm380_vm11, 1.0, %v1210_v41  ;;  %v1045_v14 = vld [vmem:[#allocation5 + $0x64] sm:$0xf]  ;;  %v1005_v15 = vld [vmem:[#allocation5 + $0x68] sm:$0xf0] }
  0x99   :  { %v1282_v46 = vpop.permute.xlu0 %64  ;;  %v1016_v12 = vor.u32 %v1047_v7, %v1013_v10 }
  0x9a   :  { %vm73_vm0 = vcmp.eq.s32.totalorder %v1265_v32, %v1282_v46  ;;  %vm74_vm1 = vcmp.eq.s32.totalorder %v1272_v38, %v1282_v46  ;;  %v1011_v46 = vld [vmem:[#allocation5 + $0x70] sm:$0xf] }
  0x9b   :  { %v238_v50 = vpop.permute.xlu1 %237  ;;  %v829_v62 = vsel %vm73_vm0, 1.0, %v1210_v41  ;;  %v830_v63 = vsel %vm74_vm1, 1.0, %v1210_v41  ;;  %710 = vmatpush.bf16.msra.mxu3 %v1016_v12 }
  0x9c   :  { %vm247_vm4 = vcmp.eq.s32.totalorder %v1265_v32, %v238_v50  ;;  %vm248_vm5 = vcmp.eq.s32.totalorder %v1272_v38, %v238_v50 }
  0x9d   :  { %v859_v16 = vsel %vm247_vm4, 1.0, %v1210_v41  ;;  %v860_v17 = vsel %vm248_vm5, 1.0, %v1210_v41 }
  0x9e   :  { %v271_v24 = vadd.f32 %v859_v16, %v227_v18  ;;  %v272_v25 = vadd.f32 %v860_v17, %v228_v19  ;;  %v1004_v17 = vor.u32 %v1046_v13, %v1003_v11 }
  0x9f   :  { %v109_v33 = vpop.permute.xlu2 %108 }
  0xa0   :  { %vm117_vm2 = vcmp.eq.s32.totalorder %v1265_v32, %v109_v33  ;;  %vm118_vm3 = vcmp.eq.s32.totalorder %v1272_v38, %v109_v33 }
  0xa1   :  { %v837_v0 = vsel %vm117_vm2, 1.0, %v1210_v41  ;;  %v838_v2 = vsel %vm118_vm3, 1.0, %v1210_v41 }
  0xa2   :  { %v1314_v1 = vpop.permute.xlu0 %155  ;;  %v141_v4 = vadd.f32 %v837_v0, %v829_v62  ;;  %v142_v5 = vadd.f32 %v838_v2, %v830_v63  ;;  %v1039_v0 = vld [vmem:[#allocation5 + $0x34] sm:$0xf]  ;;  %v981_v2 = vld [vmem:[#allocation5 + $0x38] sm:$0xf0] }
  0xa3   :  { %vm164_vm8 = vcmp.eq.s32.totalorder %v1272_v38, %v1314_v1  ;;  %v984_v10 = vor.u32 %v1039_v0, %v981_v2 }
  0xa4   :  { %v323_v6 = vpop.permute.xlu1 %322 }
  0xa5   :  { %vm333_vm6 = vcmp.eq.s32.totalorder %v1265_v32, %v323_v6  ;;  %vm334_vm7 = vcmp.eq.s32.totalorder %v1272_v38, %v323_v6  ;;  %v1048_v6 = vld [vmem:[#allocation5 + $0x74] sm:$0xf0] }
  0xa6   :  { %v873_v20 = vsel %vm333_vm6, 1.0, %v1210_v41  ;;  %v874_v21 = vsel %vm334_vm7, 1.0, %v1210_v41  ;;  %v1012_v9 = vor.u32 %v1048_v6, %v1011_v46  ;;  %vm163_vm7 = vcmp.eq.s32.totalorder %v1265_v32, %v1314_v1  ;;  %v1041_v1 = vld [vmem:[#allocation5 + $0x44] sm:$0xf] }
  0xa7   :  { %v357_v27 = vadd.f32 %v873_v20, %v313_v22  ;;  %v358_v28 = vadd.f32 %v874_v21, %v314_v23  ;;  %v1008_v20 = vor.u32 %v1045_v14, %v1005_v15  ;;  %v995_v21 = vld [vmem:[#allocation5 + $0x50] sm:$0xf]  ;;  %v1044_v22 = vld [vmem:[#allocation5 + $0x54] sm:$0xf0]  ;;  %v847_v23 = vsel %vm163_vm7, 1.0, %v1210_v41 }
  0xa8   :  { %v153_v58 = vpop.permute.xlu2 %152  ;;  %691 = vmatpush.bf16.msra.mxu2 %v1012_v9 }
  0xa9   :  { %vm161_vm4 = vcmp.eq.s32.totalorder %v1265_v32, %v153_v58  ;;  %vm162_vm9 = vcmp.eq.s32.totalorder %v1272_v38, %v153_v58  ;;  %711 = vmatpush.bf16.msra.mxu3 %v1008_v20 }
  0xaa   :  { %v845_v8 = vsel %vm161_vm4, 1.0, %v1210_v41 }
  0xab   :  { %v282_v26 = vpop.permute.xlu0 %281 }
  0xac   :  { %vm291_vm12 = vcmp.eq.s32.totalorder %v1265_v32, %v282_v26  ;;  %vm292_vm13 = vcmp.eq.s32.totalorder %v1272_v38, %v282_v26  ;;  %692 = vmatpush.bf16.msra.mxu2 %v1004_v17 }
  0xad   :  { %v367_v29 = vpop.permute.xlu1 %366  ;;  %v867_v30 = vsel %vm291_vm12, 1.0, %v1210_v41  ;;  %v868_v31 = vsel %vm292_vm13, 1.0, %v1210_v41 }
  0xae   :  { %vm377_vm14 = vcmp.eq.s32.totalorder %v1265_v32, %v367_v29  ;;  %vm378_vm15 = vcmp.eq.s32.totalorder %v1272_v38, %v367_v29  ;;  %v315_v34 = vadd.f32 %v867_v30, %v271_v24  ;;  %v316_v35 = vadd.f32 %v868_v31, %v272_v25 }
  0xaf   :  { %v881_v36 = vsel %vm377_vm14, 1.0, %v1210_v41  ;;  %v882_v37 = vsel %vm378_vm15, 1.0, %v1210_v41  ;;  %v846_v24 = vsel %vm162_vm9, 1.0, %v1210_v41  ;;  %v185_v25 = vadd.f32 %v845_v8, %v141_v4 }
  0xb0   :  { %v359_v44 = vadd.f32 %v875_v39, %v315_v34  ;;  %v360_v45 = vadd.f32 %v876_v40, %v316_v35  ;;  %v401_v47 = vadd.f32 %v881_v36, %v357_v27  ;;  %v402_v48 = vadd.f32 %v882_v37, %v358_v28  ;;  %v1043_v27 = vld [vmem:[#allocation5 + $0x54] sm:$0xf]  ;;  %v997_v28 = vld [vmem:[#allocation5 + $0x58] sm:$0xf0] }
  0xb1   :  { %v1368_v60 = vpop.permute.xlu2 %199  ;;  %v996_v37 = vor.u32 %v1044_v22, %v995_v21  ;;  %v848_v39 = vsel %vm164_vm8, 1.0, %v1210_v41  ;;  %v186_v40 = vadd.f32 %v846_v24, %v142_v5 }
  0xb2   :  { %v403_v50 = vadd.f32 %v883_v42, %v359_v44  ;;  %v404_v51 = vadd.f32 %v884_v43, %v360_v45  ;;  %v409_v52 = vmul.f32 0.125, %v401_v47  ;;  %v410_v54 = vmul.f32 0.125, %v402_v48  ;;  %v987_v44 = vld [vmem:[#allocation5 + $0x40] sm:$0xf]  ;;  %v1042_v45 = vld [vmem:[#allocation5 + $0x44] sm:$0xf0] }
  0xb3   :  { %v285_v36 = vpop.permute.xlu0 %284  ;;  %v1000_v43 = vor.u32 %v1043_v27, %v997_v28  ;;  %vm207_vm0 = vcmp.eq.s32.totalorder %v1265_v32, %v1368_v60  ;;  %vm208_vm1 = vcmp.eq.s32.totalorder %v1272_v38, %v1368_v60  ;;  %693 = vmatpush.bf16.msra.mxu2 %v996_v37  ;;  %v979_v60 = vld [vmem:[#allocation5 + $0x30] sm:$0xf] }
  0xb4   :  { %v411_v53 = vmul.f32 0.125, %v403_v50  ;;  %v412_v55 = vmul.f32 0.125, %v404_v51  ;;  %v989_v50 = vld [vmem:[#allocation5 + $0x48] sm:$0xf0]  ;;  %vm293_vm2 = vcmp.eq.s32.totalorder %v1265_v32, %v285_v36  ;;  %vm294_vm3 = vcmp.eq.s32.totalorder %v1272_v38, %v285_v36 }
  0xb5   :  { %712 = vmatpush.bf16.msra.mxu3 %v1000_v43  ;;  %v869_v62 = vsel %vm293_vm2, 1.0, %v1210_v41  ;;  %v870_v63 = vsel %vm294_vm3, 1.0, %v1210_v41 }
  0xb6   :  { %v68_v49 = vpop.permute.xlu1 %67  ;;  %v417_v56 = vpack.c.bf16 %v411_v53, %v409_v52  ;;  %v418_v57 = vpack.c.bf16 %v412_v55, %v410_v54  ;;  %v988_v55 = vor.u32 %v1042_v45, %v987_v44  ;;  %v1038_v44 = vld [vmem:[#allocation5 + $0x24] sm:$0xf0]  ;;  %v1037_v45 = vld [vmem:[#allocation5 + $0x24] sm:$0xf] }
  0xb7   :  { %vm75_vm10 = vcmp.eq.s32.totalorder %v1265_v32, %v68_v49  ;;  %vm76_vm11 = vcmp.eq.s32.totalorder %v1272_v38, %v68_v49  ;;  %v855_v49 = vsel %vm207_vm0, 1.0, %v1210_v41 }
  0xb8   :  { %557 = vmatmul.bf16.vlgmr.msra.gmra.mxu0 %v417_v56  ;;  %576 = vmatmul.bf16.vlgmr.msra.gmra.mxu1 %v418_v57  ;;  %v831_v29 = vsel %vm75_vm10, 1.0, %v1210_v41  ;;  %v832_v30 = vsel %vm76_vm11, 1.0, %v1210_v41  ;;  %v856_v56 = vsel %vm208_vm1, 1.0, %v1210_v41 }
  0xb9   :  { %694 = vmatpush.bf16.msra.mxu2 %v988_v55  ;;  %v1034_v55 = vld [vmem:[#allocation5 + $0x4] sm:$0xf0] }
  0xba   :  { %v1380_v3 = vpop.permute.xlu2 %243 }
  0xbb   :  { %vm251_vm4 = vcmp.eq.s32.totalorder %v1265_v32, %v1380_v3 }
  0xbc   :  { %v376_v9 = vpop.permute.xlu0 %375  ;;  %v863_v11 = vsel %vm251_vm4, 1.0, %v1210_v41 }
  0xbf   :  { %v112_v59 = vpop.permute.xlu1 %111 }
  0xc0   :  { %vm119_vm5 = vcmp.eq.s32.totalorder %v1265_v32, %v112_v59  ;;  %vm120_vm6 = vcmp.eq.s32.totalorder %v1272_v38, %v112_v59  ;;  %v992_v59 = vor.u32 %v1041_v1, %v989_v50  ;;  %v1035_v50 = vld [vmem:[#allocation5 + $0x14] sm:$0xf] }
  0xc1   :  { %v839_v18 = vsel %vm119_vm5, 1.0, %v1210_v41  ;;  %v840_v19 = vsel %vm120_vm6, 1.0, %v1210_v41  ;;  %vm252_vm5 = vcmp.eq.s32.totalorder %v1272_v38, %v1380_v3 }
  0xc2   :  { %v143_v33 = vadd.f32 %v839_v18, %v831_v29  ;;  %v144_v34 = vadd.f32 %v840_v19, %v832_v30  ;;  %713 = vmatpush.bf16.msra.mxu3 %v992_v59  ;;  %v864_v12 = vsel %vm252_vm5, 1.0, %v1210_v41 }
  0xc3   :  { %v1408_v26 = vpop.permute.xlu2 %328 }
  0xc4   :  { %v187_v52 = vadd.f32 %v847_v23, %v143_v33  ;;  %v188_v53 = vadd.f32 %v848_v39, %v144_v34  ;;  %vm337_vm6 = vcmp.eq.s32.totalorder %v1265_v32, %v1408_v26  ;;  %vm338_vm7 = vcmp.eq.s32.totalorder %v1272_v38, %v1408_v26 }
  0xc5   :  { %v877_v13 = vsel %vm337_vm6, 1.0, %v1210_v41  ;;  %v878_v14 = vsel %vm338_vm7, 1.0, %v1210_v41 }
  0xc6   :  { %v231_v4 = vadd.f32 %v855_v49, %v187_v52  ;;  %v232_v5 = vadd.f32 %v856_v56, %v188_v53  ;;  %714 = vmatpush.bf16.msra.mxu3 %v984_v10  ;;  %v1033_v49 = vld [vmem:[#allocation5 + $0x4] sm:$0xf]  ;;  %v605_v10 = vld [vmem:[%s1535_s3] sm:$0x3]  ;;  %s1211_s3 = smov [#allocation7]  }
  0xc7   :  { %s809_s10 = sshll.u32 %s1211_s3, 4  ;;  %s810_s10 = int_to_ptr.vmem [resolvable:$true] %s809_s10 }
  0xc8   :  { %v197_v61 = vpop.permute.xlu1 %196  ;;  %v275_v3 = vadd.f32 %v863_v11, %v231_v4  ;;  %v276_v17 = vadd.f32 %v864_v12, %v232_v5  ;;  %v607_v11 = vperm.slane %v605_v10, 0  ;;  %v608_v12 = vperm.slane %v605_v10, 1 }
  0xc9   :  { %vm205_vm12 = vcmp.eq.s32.totalorder %v1265_v32, %v197_v61  ;;  %vm206_vm13 = vcmp.eq.s32.totalorder %v1272_v38, %v197_v61  ;;  %v1040_v61 = vld [vmem:[#allocation5 + $0x34] sm:$0xf0] }
  0xca   :  { %v853_v31 = vsel %vm205_vm12, 1.0, %v1210_v41  ;;  %v854_v35 = vsel %vm206_vm13, 1.0, %v1210_v41  ;;  %v980_v7 = vor.u32 %v1040_v61, %v979_v60  ;;  %vm383_vm12 = vcmp.eq.s32.totalorder %v1265_v32, %v376_v9 }
  0xcb   :  { %v229_v47 = vadd.f32 %v853_v31, %v185_v25  ;;  %v230_v51 = vadd.f32 %v854_v35, %v186_v40  ;;  %vm384_vm13 = vcmp.eq.s32.totalorder %v1272_v38, %v376_v9  ;;  %v887_v27 = vsel %vm383_vm12, 1.0, %v1210_v41 }
  0xcc   :  { %v373_v6 = vpop.permute.xlu2 %372  ;;  %695 = vmatpush.bf16.msra.mxu2 %v980_v7  ;;  %v888_v28 = vsel %vm384_vm13, 1.0, %v1210_v41 }
  0xcd   :  { %vm381_vm10 = vcmp.eq.s32.totalorder %v1265_v32, %v373_v6  ;;  %vm382_vm11 = vcmp.eq.s32.totalorder %v1272_v38, %v373_v6 }
  0xce   :  { %v885_v20 = vsel %vm381_vm10, 1.0, %v1210_v41  ;;  %v886_v21 = vsel %vm382_vm11, 1.0, %v1210_v41 }
  0xd1   :  { %v241_v16 = vpop.permute.xlu1 %240 }
  0xd2   :  { %vm249_vm14 = vcmp.eq.s32.totalorder %v1265_v32, %v241_v16  ;;  %vm250_vm15 = vcmp.eq.s32.totalorder %v1272_v38, %v241_v16 }
  0xd3   :  { %v861_v42 = vsel %vm249_vm14, 1.0, %v1210_v41  ;;  %v862_v48 = vsel %vm250_vm15, 1.0, %v1210_v41 }
  0xd4   :  { %v273_v54 = vadd.f32 %v861_v42, %v229_v47  ;;  %v274_v57 = vadd.f32 %v862_v48, %v230_v51  ;;  %v1036_v48 = vld [vmem:[#allocation5 + $0x14] sm:$0xf0]  ;;  %v965_v51 = vld [vmem:[#allocation5 + $0x18] sm:$0xf0] }
  0xd5   :  { %v968_v53 = vor.u32 %v1035_v50, %v965_v51 }
  0xd6   :  { %v317_v46 = vadd.f32 %v869_v62, %v273_v54  ;;  %v318_v8 = vadd.f32 %v870_v63, %v274_v57  ;;  %v955_v54 = vld [vmem:[#allocation5] sm:$0xf]  ;;  %v957_v57 = vld [vmem:[#allocation5 + $0x8] sm:$0xf0] }
  0xd7   :  { %v956_v56 = vor.u32 %v1034_v55, %v955_v54 }
  0xd8   :  { %v361_v18 = vadd.f32 %v877_v13, %v317_v46  ;;  %v362_v19 = vadd.f32 %v878_v14, %v318_v8 }
  0xda   :  { %v288_v58 = vpop.permute.xlu1 %287  ;;  %v405_v29 = vadd.f32 %v885_v20, %v361_v18  ;;  %v406_v30 = vadd.f32 %v886_v21, %v362_v19 }
  0xdb   :  { %vm295_vm8 = vcmp.eq.s32.totalorder %v1265_v32, %v288_v58  ;;  %vm296_vm9 = vcmp.eq.s32.totalorder %v1272_v38, %v288_v58  ;;  %v960_v58 = vor.u32 %v1033_v49, %v957_v57 }
  0xdc   :  { %v871_v15 = vsel %vm295_vm8, 1.0, %v1210_v41  ;;  %v872_v16 = vsel %vm296_vm9, 1.0, %v1210_v41  ;;  %v413_v36 = vmul.f32 0.125, %v405_v29  ;;  %v414_v39 = vmul.f32 0.125, %v406_v30 }
  0xdd   :  { %v319_v23 = vadd.f32 %v871_v15, %v275_v3  ;;  %v320_v24 = vadd.f32 %v872_v16, %v276_v17 }
  0xe3   :  { %v332_v22 = vpop.permute.xlu1 %331 }
  0xe4   :  { %vm339_vm14 = vcmp.eq.s32.totalorder %v1265_v32, %v332_v22  ;;  %vm340_vm15 = vcmp.eq.s32.totalorder %v1272_v38, %v332_v22  ;;  %v971_v32 = vld [vmem:[#allocation5 + $0x20] sm:$0xf]  ;;  %v973_v38 = vld [vmem:[#allocation5 + $0x28] sm:$0xf0] }
  0xe5   :  { %v879_v25 = vsel %vm339_vm14, 1.0, %v1210_v41  ;;  %v880_v26 = vsel %vm340_vm15, 1.0, %v1210_v41  ;;  %v972_v47 = vor.u32 %v1038_v44, %v971_v32  ;;  %v963_v41 = vld [vmem:[#allocation5 + $0x10] sm:$0xf]  ;;  %v976_v1 = vor.u32 %v1037_v45, %v973_v38 }
  0xe6   :  { %v363_v31 = vadd.f32 %v879_v25, %v319_v23  ;;  %v364_v33 = vadd.f32 %v880_v26, %v320_v24  ;;  %v964_v52 = vor.u32 %v1036_v48, %v963_v41 }
  0xe7   :  { %696 = vmatpush.bf16.msra.mxu2 %v972_v47  ;;  %715 = vmatpush.bf16.msra.mxu3 %v976_v1 }
  0xe8   :  { %v407_v34 = vadd.f32 %v887_v27, %v363_v31  ;;  %v408_v35 = vadd.f32 %v888_v28, %v364_v33 }
  0xea   :  { %v415_v37 = vmul.f32 0.125, %v407_v34  ;;  %v416_v40 = vmul.f32 0.125, %v408_v35 }
  0xeb   :  { %697 = vmatpush.bf16.msra.mxu2 %v964_v52  ;;  %716 = vmatpush.bf16.msra.mxu3 %v968_v53 }
  0xec   :  { %v419_v42 = vpack.c.bf16 %v415_v37, %v413_v36  ;;  %v420_v43 = vpack.c.bf16 %v416_v40, %v414_v39 }
  0xee   :  { %562 = vmatmul.bf16.gmra.mxu0 %v419_v42  ;;  %581 = vmatmul.bf16.gmra.mxu1 %v420_v43 }
  0xef   :  { %698 = vmatpush.bf16.msra.mxu2 %v956_v56  ;;  %717 = vmatpush.bf16.msra.mxu3 %v960_v58 }
 0x135   :  { %v558_v59 = vpop.f32.mrf.mxu0  ;;  %v577_v60 = vpop.f32.mrf.mxu1 }
 0x136   :  { %v578_v63 = vadd.f32 %v577_v60, %v558_v59 }
 0x13d   :  { %v560_v61 = vpop.f32.mrf.mxu0  ;;  %v579_v62 = vpop.f32.mrf.mxu1 }
 0x13e   :  { %v580_v0 = vadd.f32 %v579_v62, %v560_v61 }
 0x140   :  { %v587_v2 = vpack.c.bf16 %v580_v0, %v578_v63 }
 0x142   :  { %699 = vmatmul.bf16.vlgmr.msra.gmra.mxu2 %v587_v2  ;;  %718 = vmatmul.bf16.vlgmr.msra.gmra.mxu3 %v587_v2 }
 0x16b   :  { %v563_v4 = vpop.f32.mrf.mxu0  ;;  %v582_v5 = vpop.f32.mrf.mxu1 }
 0x16c   :  { %v583_v7 = vadd.f32 %v582_v5, %v563_v4 }
 0x173   :  { %v565_v46 = vpop.f32.mrf.mxu0  ;;  %v584_v6 = vpop.f32.mrf.mxu1 }
 0x174   :  { %v585_v8 = vadd.f32 %v584_v6, %v565_v46 }
 0x176   :  { %v588_v9 = vpack.c.bf16 %v585_v8, %v583_v7 }
 0x178   :  { %704 = vmatmul.bf16.gmra.mxu2 %v588_v9  ;;  %723 = vmatmul.bf16.gmra.mxu3 %v588_v9 }
 0x1c5   :  { %v700_v13 = vpop.f32.mrf.mxu2  ;;  %v719_v14 = vpop.f32.mrf.mxu3 }
 0x1c6   :  { %v1489_v15 = vadd.f32 %v700_v13, %v607_v11  ;;  %v1491_v16 = vadd.f32 %v719_v14, %v608_v12 }
 0x1c8   :  { %v729_v3 = vmax.f32 %v1489_v15, %v1491_v16 }
 0x1ca   :  { %730 = vmax.xlane.f32.xlu1 %v729_v3 }
 0x1cd   :  { %v702_v17 = vpop.f32.mrf.mxu2  ;;  %v721_v18 = vpop.f32.mrf.mxu3 }
 0x1ce   :  { %v1495_v19 = vadd.f32 %v702_v17, %v607_v11  ;;  %v1497_v20 = vadd.f32 %v721_v18, %v608_v12 }
 0x1d0   :  { %v732_v21 = vmax.f32 %v1495_v19, %v1497_v20 }
 0x1d2   :  { %733 = vmax.xlane.f32.xlu2 %v732_v21 }
 0x1fb   :  { %v705_v22 = vpop.f32.mrf.mxu2  ;;  %v724_v23 = vpop.f32.mrf.mxu3 }
 0x1fc   :  { %v1501_v24 = vadd.f32 %v705_v22, %v607_v11  ;;  %v1503_v25 = vadd.f32 %v724_v23, %v608_v12 }
 0x1fe   :  { %v735_v26 = vmax.f32 %v1501_v24, %v1503_v25 }
 0x200   :  { %736 = vmax.xlane.f32.xlu0 %v735_v26 }
 0x203   :  { %v707_v27 = vpop.f32.mrf.mxu2  ;;  %v726_v28 = vpop.f32.mrf.mxu3 }
 0x204   :  { %v1507_v29 = vadd.f32 %v707_v27, %v607_v11  ;;  %v1509_v30 = vadd.f32 %v726_v28, %v608_v12 }
 0x206   :  { %v738_v31 = vmax.f32 %v1507_v29, %v1509_v30 }
 0x208   :  { %739 = vmax.xlane.f32.xlu2 %v738_v31 }
 0x23d   :  { %v731_v33 = vpop.xlane.xlu1 %730 }
 0x23e   :  { %v741_v34 = vsub.f32 %v1489_v15, %v731_v33  ;;  %v742_v35 = vsub.f32 %v1491_v16, %v731_v33 }
 0x240   :  { %v749_v36 = vmul.f32 1.442695, %v741_v34  ;;  %v751_v37 = vmul.f32 1.442695, %v742_v35 }
 0x242   :  { %1094 = vpow2.f32 %v749_v36 }
 0x243   :  { %1096 = vpow2.f32 %v751_v37 }
 0x245   :  { %v734_v39 = vpop.xlane.xlu2 %733 }
 0x246   :  { %v743_v40 = vsub.f32 %v1495_v19, %v734_v39  ;;  %v744_v42 = vsub.f32 %v1497_v20, %v734_v39 }
 0x248   :  { %v1095_v43 = vpop.eup %1094  ;;  %v753_v32 = vmul.f32 1.442695, %v743_v40  ;;  %v755_v44 = vmul.f32 1.442695, %v744_v42 }
 0x249   :  { %v1097_v45 = vpop.eup %1096 }
 0x24a   :  { %1098 = vpow2.f32 %v753_v32  ;;  %v765_v47 = vadd.f32 %v1097_v45, %v1095_v43 }
 0x24b   :  { %1100 = vpow2.f32 %v755_v44 }
 0x24c   :  { %766 = vadd.xlane.f32.xlu1 %v765_v47 }
 0x250   :  { %v1099_v38 = vpop.eup %1098 }
 0x251   :  { %v1101_v41 = vpop.eup %1100 }
 0x252   :  { %v768_v48 = vadd.f32 %v1101_v41, %v1099_v38 }
 0x254   :  { %769 = vadd.xlane.f32.xlu2 %v768_v48 }
 0x273   :  { %v737_v1 = vpop.xlane.xlu0 %736 }
 0x274   :  { %v745_v50 = vsub.f32 %v1501_v24, %v737_v1  ;;  %v746_v51 = vsub.f32 %v1503_v25, %v737_v1 }
 0x276   :  { %v757_v52 = vmul.f32 1.442695, %v745_v50  ;;  %v759_v53 = vmul.f32 1.442695, %v746_v51 }
 0x278   :  { %1102 = vpow2.f32 %v757_v52 }
 0x279   :  { %1104 = vpow2.f32 %v759_v53 }
 0x27b   :  { %v740_v54 = vpop.xlane.xlu2 %739 }
 0x27c   :  { %v747_v55 = vsub.f32 %v1507_v29, %v740_v54  ;;  %v748_v49 = vsub.f32 %v1509_v30, %v740_v54 }
 0x27e   :  { %v1103_v56 = vpop.eup %1102  ;;  %v761_v57 = vmul.f32 1.442695, %v747_v55  ;;  %v763_v58 = vmul.f32 1.442695, %v748_v49 }
 0x27f   :  { %v1105_v59 = vpop.eup %1104 }
 0x280   :  { %1106 = vpow2.f32 %v761_v57  ;;  %v771_v60 = vadd.f32 %v1105_v59, %v1103_v56 }
 0x281   :  { %1108 = vpow2.f32 %v763_v58 }
 0x282   :  { %772 = vadd.xlane.f32.xlu1 %v771_v60 }
 0x286   :  { %v1107_v61 = vpop.eup %1106 }
 0x287   :  { %v1109_v62 = vpop.eup %1108 }
 0x288   :  { %v774_v63 = vadd.f32 %v1109_v62, %v1107_v61 }
 0x28a   :  { %775 = vadd.xlane.f32.xlu2 %v774_v63 }
 0x2bf   :  { %v767_v0 = vpop.xlane.xlu1 %766 }
 0x2c0   :  { %1110 = vlog2.f32 %v767_v0 }
 0x2c6   :  { %v1111_v2 = vpop.eup %1110 }
 0x2c7   :  { %v778_v4 = vmul.f32 0.6931472, %v1111_v2  ;;  %v770_v5 = vpop.xlane.xlu2 %769 }
 0x2c8   :  { %1112 = vlog2.f32 %v770_v5 }
 0x2c9   :  { %v785_v46 = vadd.f32 %v778_v4, %v731_v33 }
 0x2cb   :  { %v789_v6 = vsub.f32 %v1489_v15, %v785_v46  ;;  %v790_v7 = vsub.f32 %v1491_v16, %v785_v46 }
 0x2cd   :  { %797 = vst [vmem:[#allocation7] sm:$0xff] %v789_v6 }
 0x2ce   :  { %v1113_v8 = vpop.eup %1112  ;;  %798 = vst [vmem:[#allocation7 + $0x8] sm:$0xff] %v790_v7 }
 0x2cf   :  { %v780_v9 = vmul.f32 0.6931472, %v1113_v8 }
 0x2d1   :  { %v786_v10 = vadd.f32 %v780_v9, %v734_v39 }
 0x2d3   :  { %v791_v11 = vsub.f32 %v1495_v19, %v786_v10  ;;  %v792_v12 = vsub.f32 %v1497_v20, %v786_v10 }
 0x2d5   :  { %799 = vst [vmem:[#allocation7 + $0x10] sm:$0xff] %v791_v11 }
 0x2d6   :  { %800 = vst [vmem:[#allocation7 + $0x18] sm:$0xff] %v792_v12 }
 0x2f5   :  { %v773_v13 = vpop.xlane.xlu1 %772 }
 0x2f6   :  { %1114 = vlog2.f32 %v773_v13 }
 0x2fc   :  { %v1115_v14 = vpop.eup %1114 }
 0x2fd   :  { %v782_v3 = vmul.f32 0.6931472, %v1115_v14  ;;  %v776_v17 = vpop.xlane.xlu2 %775 }
 0x2fe   :  { %1116 = vlog2.f32 %v776_v17 }
 0x2ff   :  { %v787_v15 = vadd.f32 %v782_v3, %v737_v1 }
 0x301   :  { %v793_v16 = vsub.f32 %v1501_v24, %v787_v15  ;;  %v794_v18 = vsub.f32 %v1503_v25, %v787_v15 }
 0x303   :  { %801 = vst [vmem:[#allocation7 + $0x20] sm:$0xff] %v793_v16 }
 0x304   :  { %v1117_v21 = vpop.eup %1116  ;;  %802 = vst [vmem:[#allocation7 + $0x28] sm:$0xff] %v794_v18 }
 0x305   :  { %v784_v22 = vmul.f32 0.6931472, %v1117_v21 }
 0x307   :  { %v788_v19 = vadd.f32 %v784_v22, %v740_v54 }
 0x309   :  { %v795_v20 = vsub.f32 %v1507_v29, %v788_v19  ;;  %v796_v23 = vsub.f32 %v1509_v30, %v788_v19 }
 0x30b   :  { %803 = vst [vmem:[#allocation7 + $0x30] sm:$0xff] %v795_v20 }
 0x30c   :  { %804 = vst [vmem:[#allocation7 + $0x38] sm:$0xff] %v796_v23 }
 0x30d   :  { %817 = dma.vmem_to_hbm [thread:$0]  %s810_s10, 1024, %s812_s13, [#allocation4], %s1212_s14, %s1212_s14, %s1213_s15  }
 0x30e   :  { %1194 = dma.done.wait [#allocation4], 1024  }
 0x30f   :  { %1195 = vsyncadd [#allocation4], 4294966272 }
 0x310   :  { %822 = vsyncpa [#allocation3], 1 }
 0x311   :  { %823 = vsyncpa [#allocation6], 1 }
 0x312   :  { %824 = vsyncpa [#allocation4], 1 }

</bundles_post_ra>
